<compile_context>
chip_gen: v5e
topology: v5e:2x2
jax: 0.10.0
libtpu: 0.0.40
codegen_flags: <defaults>
</compile_context>

<pallas_src>
import functools
import math

import jax
import jax.numpy as jnp
from jax.experimental import pallas as pl
from jax.experimental.pallas import tpu as pltpu

COV_VAR_TRAIN = 0.5   # PPO train() diagonal covariance value
LANE = 128
SUBLANE = 8
BF16_PACK = 16        # bf16 sublane packing for the w0 contraction dim


def _round_up(v, m):
    return (v + m - 1) // m * m


def ppo_forward_kernel(x_ref, eps_ref,
                       w0_ref, b0_ref, w1_ref, b1_ref, w2_ref, b2_ref,
                       w3_ref, b3_ref, w4_ref, b4_ref,
                       action_ref, logprob_ref, *, sigma, logprob_const):
    # ---- actor MLP hot path: bf16 MXU matmuls, f32 accumulation ----
    h = x_ref[...]                                        # bf16 (tb, in_k)
    for w_ref, b_ref in ((w0_ref, b0_ref), (w1_ref, b1_ref),
                         (w2_ref, b2_ref), (w3_ref, b3_ref)):
        y = jnp.dot(h, w_ref[...], preferred_element_type=jnp.float32) + b_ref[...]
        h = jnp.maximum(y, 0.0).astype(jnp.bfloat16)
    # Last layer keeps its true output width -> result is (tb, out_dim) directly.
    mean = jnp.dot(h, w4_ref[...], preferred_element_type=jnp.float32) + b4_ref[...]

    # ---- MultivariateNormal(mean, cov*I): sample + log_prob ----
    eps = eps_ref[...]                                    # f32 (tb, out_dim)
    action_ref[...] = mean + jnp.float32(sigma) * eps

    # diff^2 / cov == eps^2 exactly, so log_prob only needs eps (overlaps the matmuls).
    maha = jnp.sum(eps * eps, axis=-1, keepdims=True)     # (tb, 1), true out_dim lanes only
    logprob_ref[...] = jnp.float32(-0.5) * maha + jnp.float32(logprob_const)


def init_params(key, input_dim, hidden_dim, output_dim):
    """PyTorch-Linear-style uniform init; weights stored [in, out], biases [1, out], f32."""
    dims = [(input_dim, hidden_dim)] + [(hidden_dim, hidden_dim)] * 3 + [(hidden_dim, output_dim)]
    params = {}
    for i, (fan_in, fan_out) in enumerate(dims):
        key, kw, kb = jax.random.split(key, 3)
        bound = 1.0 / math.sqrt(fan_in)
        params[f"w{i}"] = jax.random.uniform(kw, (fan_in, fan_out), jnp.float32, -bound, bound)
        params[f"b{i}"] = jax.random.uniform(kb, (1, fan_out), jnp.float32, -bound, bound)
    return params


def prepare_params(params, input_dim, hidden_dim, output_dim):
    """One-time host-side prep (weights are VMEM-resident, so padding them is free):
      w0: (round_up(in,16), h_p) bf16   hidden w: (h_p, h_p) bf16
      w4: (h_p, out_dim) bf16 -- NO lane padding so the action store stays unpadded.
    """
    in_k = _round_up(input_dim, BF16_PACK)
    h_p = _round_up(hidden_dim, LANE)
    dims = [(input_dim, in_k, hidden_dim, h_p)] + \
           [(hidden_dim, h_p, hidden_dim, h_p)] * 3 + \
           [(hidden_dim, h_p, output_dim, output_dim)]
    prepped = {}
    for i, (fi, fip, fo, fop) in enumerate(dims):
        wp = jnp.zeros((fip, fop), jnp.bfloat16).at[:fi, :fo].set(
            params[f"w{i}"].astype(jnp.bfloat16))
        bp = jnp.zeros((1, fop), jnp.float32).at[:, :fo].set(params[f"b{i}"])
        prepped[f"w{i}"] = wp
        prepped[f"b{i}"] = bp
    return prepped


def ppo_forward(x, eps, prepped, *, cov_var=COV_VAR_TRAIN, block_b=2048):
    """Returns (action [B, output_dim], log_prob [B]) like PPO.forward."""
    B, input_dim = x.shape
    out_dim = eps.shape[1]
    in_k, h_p = prepped["w0"].shape
    assert prepped["w4"].shape[1] == out_dim

    # bf16 x at the boundary: kernel matmuls are bf16 anyway -> halves the x DMA.
    x = x.astype(jnp.bfloat16)
    if input_dim != in_k:   # tiny (<16 lanes) pad only if in_dim isn't bf16-pack aligned
        x = jnp.pad(x, ((0, 0), (0, in_k - input_dim)))
    eps = eps.astype(jnp.float32)

    # Batch tile: big (amortize per-step overhead), multiple of 8, but capped so the
    # grid has >=2 steps whenever the batch allows -> v7x's 2nd TensorCore is used.
    assert block_b % SUBLANE == 0
    b_ceil = _round_up(B, SUBLANE)
    tb = min(block_b, b_ceil)
    if b_ceil >= 2 * SUBLANE:
        tb = min(tb, max(SUBLANE, _round_up((B + 1) // 2, SUBLANE)))
    grid = pl.cdiv(B, tb)   # trailing partial block: OOB reads undefined, OOB writes dropped

    sigma = math.sqrt(cov_var)
    logprob_const = -0.5 * out_dim * (math.log(2.0 * math.pi) + math.log(cov_var))
    kernel = functools.partial(ppo_forward_kernel, sigma=sigma, logprob_const=logprob_const)

    batched = lambda i: (i, 0)   # x / eps / outputs walk the batch grid
    resident = lambda i: (0, 0)  # weights & biases: same block every step -> stay in VMEM

    in_specs = [pl.BlockSpec((tb, in_k), batched),
                pl.BlockSpec((tb, out_dim), batched)]
    weight_args = []
    for i in range(5):
        w = prepped[f"w{i}"]
        b = prepped[f"b{i}"]
        in_specs.append(pl.BlockSpec(w.shape, resident))
        in_specs.append(pl.BlockSpec(b.shape, resident))
        weight_args.extend((w, b))

    action, logprob = pl.pallas_call(
        kernel,
        grid=(grid,),
        in_specs=in_specs,
        out_specs=(pl.BlockSpec((tb, out_dim), batched),
                   pl.BlockSpec((tb, 1), batched)),
        out_shape=(jax.ShapeDtypeStruct((B, out_dim), jnp.float32),
                   jax.ShapeDtypeStruct((B, 1), jnp.float32)),
        compiler_params=pltpu.CompilerParams(dimension_semantics=("parallel",)),
    )(x, eps, *weight_args)

    return action, logprob[:, 0]


def ppo_forward_reference(x, eps, params, cov_var=COV_VAR_TRAIN):
    """Pure-JAX reference following the same bf16-matmul / f32-accumulate recipe."""
    h = x.astype(jnp.float32)
    for i in range(4):
        w = params[f"w{i}"].astype(jnp.bfloat16)
        h = jnp.maximum(
            jnp.dot(h.astype(jnp.bfloat16), w, preferred_element_type=jnp.float32)
            + params[f"b{i}"], 0.0)
    mean = jnp.dot(h.astype(jnp.bfloat16), params["w4"].astype(jnp.bfloat16),
                   preferred_element_type=jnp.float32) + params["b4"]
    action = mean + math.sqrt(cov_var) * eps
    k = eps.shape[-1]
    logprob = -0.5 * (jnp.sum(eps * eps, axis=-1)
                      + k * math.log(2.0 * math.pi)
                      + k * math.log(cov_var))
    return action, logprob


if __name__ == "__main__":
    input_dim, hidden_dim, output_dim = 16, 32, 8
    batch = 8

    key = jax.random.PRNGKey(0)
    key, kx, keps, kp = jax.random.split(key, 4)

    x = jax.random.normal(kx, (batch, input_dim), jnp.float32)
    eps = jax.random.normal(keps, (batch, output_dim), jnp.float32)
    params = init_params(kp, input_dim, hidden_dim, output_dim)
    prepped = prepare_params(params, input_dim, hidden_dim, output_dim)

    action, log_prob = ppo_forward(x, eps, prepped)
    jax.block_until_ready((action, log_prob))

    ref_action, ref_logprob = ppo_forward_reference(x, eps, params)
    assert action.shape == (batch, output_dim)
    assert log_prob.shape == (batch,)
    assert jnp.allclose(action, ref_action, atol=2e-3, rtol=2e-3)
    assert jnp.allclose(log_prob, ref_logprob, atol=1e-4, rtol=1e-4)

    # Second check: ragged batch + multi-step grid with a partial trailing block
    # (exercises the unpadded-batch OOB-read / masked-write path).
    batch2 = 300
    key, kx2, keps2 = jax.random.split(key, 3)
    x2 = jax.random.normal(kx2, (batch2, input_dim), jnp.float32)
    eps2 = jax.random.normal(keps2, (batch2, output_dim), jnp.float32)
    a2, lp2 = ppo_forward(x2, eps2, prepped, block_b=128)
    jax.block_until_ready((a2, lp2))
    ra2, rlp2 = ppo_forward_reference(x2, eps2, params)
    assert a2.shape == (batch2, output_dim) and lp2.shape == (batch2,)
    assert jnp.allclose(a2, ra2, atol=2e-3, rtol=2e-3)
    assert jnp.allclose(lp2, rlp2, atol=1e-4, rtol=1e-4)

    print("KERNEL_OK")
</pallas_src>

<mosaic_0001>
module attributes {stable_mosaic.version = 11 : i64} {
  func.func @ppo_forward_kernel(%arg0: i32, %arg1: memref<8x16xbf16, #tpu.memory_space<vmem>>, %arg2: memref<8x8xf32, #tpu.memory_space<vmem>>, %arg3: memref<16x128xbf16, #tpu.memory_space<vmem>>, %arg4: memref<1x128xf32, #tpu.memory_space<vmem>>, %arg5: memref<128x128xbf16, #tpu.memory_space<vmem>>, %arg6: memref<1x128xf32, #tpu.memory_space<vmem>>, %arg7: memref<128x128xbf16, #tpu.memory_space<vmem>>, %arg8: memref<1x128xf32, #tpu.memory_space<vmem>>, %arg9: memref<128x128xbf16, #tpu.memory_space<vmem>>, %arg10: memref<1x128xf32, #tpu.memory_space<vmem>>, %arg11: memref<128x8xbf16, #tpu.memory_space<vmem>>, %arg12: memref<1x8xf32, #tpu.memory_space<vmem>>, %arg13: memref<8x8xf32, #tpu.memory_space<vmem>>, %arg14: memref<8x1xf32, #tpu.memory_space<vmem>>) attributes {dimension_semantics = [#tpu.dimension_semantics<parallel>], iteration_bounds = array<i64: 1>, scalar_prefetch = 0 : i64, scratch_operands = 0 : i64, tpu.core_type = #tpu.core_type<tc>, window_params = [{transform_indices = @transform_0, window_bounds = array<i64: 8, 16>}, {transform_indices = @transform_1, window_bounds = array<i64: 8, 8>}, {pipeline_mode = #tpu.pipeline_mode<synchronous>, transform_indices = @transform_2, window_bounds = array<i64: 16, 128>}, {pipeline_mode = #tpu.pipeline_mode<synchronous>, transform_indices = @transform_3, window_bounds = array<i64: 1, 128>}, {pipeline_mode = #tpu.pipeline_mode<synchronous>, transform_indices = @transform_4, window_bounds = array<i64: 128, 128>}, {pipeline_mode = #tpu.pipeline_mode<synchronous>, transform_indices = @transform_5, window_bounds = array<i64: 1, 128>}, {pipeline_mode = #tpu.pipeline_mode<synchronous>, transform_indices = @transform_6, window_bounds = array<i64: 128, 128>}, {pipeline_mode = #tpu.pipeline_mode<synchronous>, transform_indices = @transform_7, window_bounds = array<i64: 1, 128>}, {pipeline_mode = #tpu.pipeline_mode<synchronous>, transform_indices = @transform_8, window_bounds = array<i64: 128, 128>}, {pipeline_mode = #tpu.pipeline_mode<synchronous>, transform_indices = @transform_9, window_bounds = array<i64: 1, 128>}, {pipeline_mode = #tpu.pipeline_mode<synchronous>, transform_indices = @transform_10, window_bounds = array<i64: 128, 8>}, {pipeline_mode = #tpu.pipeline_mode<synchronous>, transform_indices = @transform_11, window_bounds = array<i64: 1, 8>}, {transform_indices = @transform_12, window_bounds = array<i64: 8, 8>}, {transform_indices = @transform_13, window_bounds = array<i64: 8, 1>}]} {
    %c0 = arith.constant 0 : index
    %c0_0 = arith.constant 0 : index
    %0 = vector.load %arg1[%c0, %c0_0] : memref<8x16xbf16, #tpu.memory_space<vmem>>, vector<8x16xbf16>
    %c0_1 = arith.constant 0 : index
    %c0_2 = arith.constant 0 : index
    %1 = vector.load %arg3[%c0_1, %c0_2] : memref<16x128xbf16, #tpu.memory_space<vmem>>, vector<16x128xbf16>
    %cst = arith.constant dense<0.000000e+00> : vector<8x128xf32>
    %2 = tpu.matmul %0, %1, %cst {dimension_numbers = #tpu.dot_dimension_numbers<[1], [0], [0], [1], [0, 0, 1, 1], [], []>} : vector<8x16xbf16>, vector<16x128xbf16>, vector<8x128xf32> -> vector<8x128xf32>
    %c0_3 = arith.constant 0 : index
    %c0_4 = arith.constant 0 : index
    %3 = vector.load %arg4[%c0_3, %c0_4] : memref<1x128xf32, #tpu.memory_space<vmem>>, vector<1x128xf32>
    %4 = vector.broadcast %3 : vector<1x128xf32> to vector<8x128xf32>
    %5 = arith.addf %2, %4 : vector<8x128xf32>
    %cst_5 = arith.constant 0.000000e+00 : f32
    %6 = vector.broadcast %cst_5 : f32 to vector<8x128xf32>
    %7 = arith.maximumf %5, %6 : vector<8x128xf32>
    %8 = arith.truncf %7 : vector<8x128xf32> to vector<8x128xbf16>
    %c0_6 = arith.constant 0 : index
    %c0_7 = arith.constant 0 : index
    %9 = vector.load %arg5[%c0_6, %c0_7] : memref<128x128xbf16, #tpu.memory_space<vmem>>, vector<128x128xbf16>
    %cst_8 = arith.constant dense<0.000000e+00> : vector<8x128xf32>
    %10 = tpu.matmul %8, %9, %cst_8 {dimension_numbers = #tpu.dot_dimension_numbers<[1], [0], [0], [1], [0, 0, 1, 1], [], []>} : vector<8x128xbf16>, vector<128x128xbf16>, vector<8x128xf32> -> vector<8x128xf32>
    %c0_9 = arith.constant 0 : index
    %c0_10 = arith.constant 0 : index
    %11 = vector.load %arg6[%c0_9, %c0_10] : memref<1x128xf32, #tpu.memory_space<vmem>>, vector<1x128xf32>
    %12 = vector.broadcast %11 : vector<1x128xf32> to vector<8x128xf32>
    %13 = arith.addf %10, %12 : vector<8x128xf32>
    %cst_11 = arith.constant 0.000000e+00 : f32
    %14 = vector.broadcast %cst_11 : f32 to vector<8x128xf32>
    %15 = arith.maximumf %13, %14 : vector<8x128xf32>
    %16 = arith.truncf %15 : vector<8x128xf32> to vector<8x128xbf16>
    %c0_12 = arith.constant 0 : index
    %c0_13 = arith.constant 0 : index
    %17 = vector.load %arg7[%c0_12, %c0_13] : memref<128x128xbf16, #tpu.memory_space<vmem>>, vector<128x128xbf16>
    %cst_14 = arith.constant dense<0.000000e+00> : vector<8x128xf32>
    %18 = tpu.matmul %16, %17, %cst_14 {dimension_numbers = #tpu.dot_dimension_numbers<[1], [0], [0], [1], [0, 0, 1, 1], [], []>} : vector<8x128xbf16>, vector<128x128xbf16>, vector<8x128xf32> -> vector<8x128xf32>
    %c0_15 = arith.constant 0 : index
    %c0_16 = arith.constant 0 : index
    %19 = vector.load %arg8[%c0_15, %c0_16] : memref<1x128xf32, #tpu.memory_space<vmem>>, vector<1x128xf32>
    %20 = vector.broadcast %19 : vector<1x128xf32> to vector<8x128xf32>
    %21 = arith.addf %18, %20 : vector<8x128xf32>
    %cst_17 = arith.constant 0.000000e+00 : f32
    %22 = vector.broadcast %cst_17 : f32 to vector<8x128xf32>
    %23 = arith.maximumf %21, %22 : vector<8x128xf32>
    %24 = arith.truncf %23 : vector<8x128xf32> to vector<8x128xbf16>
    %c0_18 = arith.constant 0 : index
    %c0_19 = arith.constant 0 : index
    %25 = vector.load %arg9[%c0_18, %c0_19] : memref<128x128xbf16, #tpu.memory_space<vmem>>, vector<128x128xbf16>
    %cst_20 = arith.constant dense<0.000000e+00> : vector<8x128xf32>
    %26 = tpu.matmul %24, %25, %cst_20 {dimension_numbers = #tpu.dot_dimension_numbers<[1], [0], [0], [1], [0, 0, 1, 1], [], []>} : vector<8x128xbf16>, vector<128x128xbf16>, vector<8x128xf32> -> vector<8x128xf32>
    %c0_21 = arith.constant 0 : index
    %c0_22 = arith.constant 0 : index
    %27 = vector.load %arg10[%c0_21, %c0_22] : memref<1x128xf32, #tpu.memory_space<vmem>>, vector<1x128xf32>
    %28 = vector.broadcast %27 : vector<1x128xf32> to vector<8x128xf32>
    %29 = arith.addf %26, %28 : vector<8x128xf32>
    %cst_23 = arith.constant 0.000000e+00 : f32
    %30 = vector.broadcast %cst_23 : f32 to vector<8x128xf32>
    %31 = arith.maximumf %29, %30 : vector<8x128xf32>
    %32 = arith.truncf %31 : vector<8x128xf32> to vector<8x128xbf16>
    %c0_24 = arith.constant 0 : index
    %c0_25 = arith.constant 0 : index
    %33 = vector.load %arg11[%c0_24, %c0_25] : memref<128x8xbf16, #tpu.memory_space<vmem>>, vector<128x8xbf16>
    %cst_26 = arith.constant dense<0.000000e+00> : vector<8x8xf32>
    %34 = tpu.matmul %32, %33, %cst_26 {dimension_numbers = #tpu.dot_dimension_numbers<[1], [0], [0], [1], [0, 0, 1, 1], [], []>} : vector<8x128xbf16>, vector<128x8xbf16>, vector<8x8xf32> -> vector<8x8xf32>
    %c0_27 = arith.constant 0 : index
    %c0_28 = arith.constant 0 : index
    %35 = vector.load %arg12[%c0_27, %c0_28] : memref<1x8xf32, #tpu.memory_space<vmem>>, vector<1x8xf32>
    %36 = vector.broadcast %35 : vector<1x8xf32> to vector<8x8xf32>
    %37 = arith.addf %34, %36 : vector<8x8xf32>
    %c0_29 = arith.constant 0 : index
    %c0_30 = arith.constant 0 : index
    %38 = vector.load %arg2[%c0_29, %c0_30] : memref<8x8xf32, #tpu.memory_space<vmem>>, vector<8x8xf32>
    %cst_31 = arith.constant 0.707106769 : f32
    %39 = vector.broadcast %cst_31 : f32 to vector<8x8xf32>
    %40 = arith.mulf %39, %38 : vector<8x8xf32>
    %41 = arith.addf %37, %40 : vector<8x8xf32>
    %c0_32 = arith.constant 0 : index
    %c0_33 = arith.constant 0 : index
    %42 = vector.load %arg13[%c0_32, %c0_33] : memref<8x8xf32, #tpu.memory_space<vmem>>, vector<8x8xf32>
    tpu.vector_store %arg13[%c0_32, %c0_33], %41 {strides = array<i32>} : memref<8x8xf32, #tpu.memory_space<vmem>>, vector<8x8xf32>,
    %43 = arith.mulf %38, %38 : vector<8x8xf32>
    %cst_34 = arith.constant dense<0.000000e+00> : vector<8xf32>
    %44 = vector.multi_reduction <add>, %43, %cst_34 [1] : vector<8x8xf32> to vector<8xf32>
    %45 = vector.shape_cast %44 : vector<8xf32> to vector<8x1xf32>
    %cst_35 = arith.constant -5.000000e-01 : f32
    %46 = vector.broadcast %cst_35 : f32 to vector<8x1xf32>
    %47 = arith.mulf %46, %45 : vector<8x1xf32>
    %cst_36 = arith.constant -4.57891941 : f32
    %48 = vector.broadcast %cst_36 : f32 to vector<8x1xf32>
    %49 = arith.addf %47, %48 : vector<8x1xf32>
    %c0_37 = arith.constant 0 : index
    %c0_38 = arith.constant 0 : index
    %50 = vector.load %arg14[%c0_37, %c0_38] : memref<8x1xf32, #tpu.memory_space<vmem>>, vector<8x1xf32>
    tpu.vector_store %arg14[%c0_37, %c0_38], %49 {strides = array<i32>} : memref<8x1xf32, #tpu.memory_space<vmem>>, vector<8x1xf32>,
    return
  }
  func.func @transform_0(%arg0: i32) -> (i32, i32) {
    %c0_i32 = arith.constant 0 : i32
    %c0_i32_0 = arith.constant 0 : i32
    return %arg0, %c0_i32 : i32, i32
  }
  func.func @transform_1(%arg0: i32) -> (i32, i32) {
    %c0_i32 = arith.constant 0 : i32
    %c0_i32_0 = arith.constant 0 : i32
    return %arg0, %c0_i32 : i32, i32
  }
  func.func @transform_2(%arg0: i32) -> (i32, i32) {
    %c0_i32 = arith.constant 0 : i32
    %c0_i32_0 = arith.constant 0 : i32
    %c0_i32_1 = arith.constant 0 : i32
    return %c0_i32, %c0_i32_0 : i32, i32
  }
  func.func @transform_3(%arg0: i32) -> (i32, i32) {
    %c0_i32 = arith.constant 0 : i32
    %c0_i32_0 = arith.constant 0 : i32
    %c0_i32_1 = arith.constant 0 : i32
    return %c0_i32, %c0_i32_0 : i32, i32
  }
  func.func @transform_4(%arg0: i32) -> (i32, i32) {
    %c0_i32 = arith.constant 0 : i32
    %c0_i32_0 = arith.constant 0 : i32
    %c0_i32_1 = arith.constant 0 : i32
    return %c0_i32, %c0_i32_0 : i32, i32
  }
  func.func @transform_5(%arg0: i32) -> (i32, i32) {
    %c0_i32 = arith.constant 0 : i32
    %c0_i32_0 = arith.constant 0 : i32
    %c0_i32_1 = arith.constant 0 : i32
    return %c0_i32, %c0_i32_0 : i32, i32
  }
  func.func @transform_6(%arg0: i32) -> (i32, i32) {
    %c0_i32 = arith.constant 0 : i32
    %c0_i32_0 = arith.constant 0 : i32
    %c0_i32_1 = arith.constant 0 : i32
    return %c0_i32, %c0_i32_0 : i32, i32
  }
  func.func @transform_7(%arg0: i32) -> (i32, i32) {
    %c0_i32 = arith.constant 0 : i32
    %c0_i32_0 = arith.constant 0 : i32
    %c0_i32_1 = arith.constant 0 : i32
    return %c0_i32, %c0_i32_0 : i32, i32
  }
  func.func @transform_8(%arg0: i32) -> (i32, i32) {
    %c0_i32 = arith.constant 0 : i32
    %c0_i32_0 = arith.constant 0 : i32
    %c0_i32_1 = arith.constant 0 : i32
    return %c0_i32, %c0_i32_0 : i32, i32
  }
  func.func @transform_9(%arg0: i32) -> (i32, i32) {
    %c0_i32 = arith.constant 0 : i32
    %c0_i32_0 = arith.constant 0 : i32
    %c0_i32_1 = arith.constant 0 : i32
    return %c0_i32, %c0_i32_0 : i32, i32
  }
  func.func @transform_10(%arg0: i32) -> (i32, i32) {
    %c0_i32 = arith.constant 0 : i32
    %c0_i32_0 = arith.constant 0 : i32
    %c0_i32_1 = arith.constant 0 : i32
    return %c0_i32, %c0_i32_0 : i32, i32
  }
  func.func @transform_11(%arg0: i32) -> (i32, i32) {
    %c0_i32 = arith.constant 0 : i32
    %c0_i32_0 = arith.constant 0 : i32
    %c0_i32_1 = arith.constant 0 : i32
    return %c0_i32, %c0_i32_0 : i32, i32
  }
  func.func @transform_12(%arg0: i32) -> (i32, i32) {
    %c0_i32 = arith.constant 0 : i32
    %c0_i32_0 = arith.constant 0 : i32
    return %arg0, %c0_i32 : i32, i32
  }
  func.func @transform_13(%arg0: i32) -> (i32, i32) {
    %c0_i32 = arith.constant 0 : i32
    %c0_i32_0 = arith.constant 0 : i32
    return %arg0, %c0_i32 : i32, i32
  }
}

</mosaic_0001>

<bundles_post_ra>
// kernel: tpu_custom_call.1
= control target key start
LH: loop header
LB: loop body
LE: loop exit
PB: predicated region body
PF: predicated region fallthrough
CT: control target
= control target key end

     0   :  { %19 = vsyncpa [#allocation3], 0  ;;  %s973_s0 = inlined_call_operand.vmem [shape: bf16[8,16], index: 0, kind: input, shape index: {}]   ;;  %s974_s1 = inlined_call_operand.hbm [shape: f32[8,8], index: 1, kind: input, shape index: {}]   ;;  %s975_s2 = inlined_call_operand.hbm [shape: bf16[16,128], index: 2, kind: input, shape index: {}]   ;;  %s976_s3 = inlined_call_operand.vmem [shape: f32[1,128], index: 3, kind: input, shape index: {}]   ;;  %s977_s4 = inlined_call_operand.vmem [shape: bf16[128,128], index: 4, kind: input, shape index: {}]   ;;  %s978_s5 = inlined_call_operand.vmem [shape: f32[1,128], index: 5, kind: input, shape index: {}]   ;;  %s979_s6 = inlined_call_operand.hbm [shape: bf16[128,128], index: 6, kind: input, shape index: {}]   ;;  %s980_s7 = inlined_call_operand.vmem [shape: f32[1,128], index: 7, kind: input, shape index: {}]   ;;  %s981_s8 = inlined_call_operand.hbm [shape: bf16[128,128], index: 8, kind: input, shape index: {}]   ;;  %s982_s9 = inlined_call_operand.vmem [shape: f32[1,128], index: 9, kind: input, shape index: {}]   ;;  %s983_s10 = inlined_call_operand.vmem [shape: bf16[128,8], index: 10, kind: input, shape index: {}]   ;;  %s984_s11 = inlined_call_operand.vmem [shape: f32[1,8], index: 11, kind: input, shape index: {}]   ;;  %s985_s12 = inlined_call_operand.hbm [shape: f32[8,8], index: 12, kind: output, shape index: {0}]   ;;  %s986_s13 = inlined_call_operand.vmem [shape: f32[8,1], index: 13, kind: output, shape index: {1}]  }
   0x1   :  { %20 = vsyncpa [#allocation6], 0 }
   0x2   :  { %21 = vsyncpa [#allocation9], 0  ;;  %s40_s27 = sshll.u32 %s975_s2, 4  ;;  %s41_s27 = int_to_ptr.hbm [resolvable:$true] %s40_s27 }
   0x3   :  { %22 = vsyncpa [#allocation4], 0  ;;  %s810_s28 = smov [#allocation5]   ;;  %s30_s15 = sshll.u32 %s974_s1, 4  ;;  %s31_s15 = int_to_ptr.hbm [resolvable:$true] %s30_s15 }
   0x4   :  { %s42_s29 = sshll.u32 %s810_s28, 4  ;;  %s811_s16 = smov 64   ;;  %s43_s29 = int_to_ptr.vmem [resolvable:$true] %s42_s29 }
   0x5   :  { %s812_s17 = smov 4   ;;  %s813_s18 = smov [#allocation2]  }
   0x6   :  { %48 = dma.hbm_to_vmem [thread:$0]  %s41_s27, 128, %s43_s29, [#allocation6], %s811_s16, %s811_s16, %s812_s17  }
   0x7   :  { %s32_s19 = sshll.u32 %s813_s18, 4  ;;  %s59_s22 = sshll.u32 %s979_s6, 4  ;;  %s33_s19 = int_to_ptr.vmem [resolvable:$true] %s32_s19  ;;  %s60_s22 = int_to_ptr.hbm [resolvable:$true] %s59_s22 }
   0x8   :  { %35 = dma.hbm_to_vmem [thread:$0]  %s31_s15, 128, %s33_s19, [#allocation3]  }
   0x9   :  { %s74_s24 = sshll.u32 %s981_s8, 4  ;;  %s814_s25 = smov [#allocation7]   ;;  %s75_s24 = int_to_ptr.hbm [resolvable:$true] %s74_s24 }
   0xa   :  { %s61_s26 = sshll.u32 %s814_s25, 4  ;;  %s815_s1 = smov [#allocation8]   ;;  %s62_s26 = int_to_ptr.vmem [resolvable:$true] %s61_s26 }
   0xb   :  { %67 = dma.hbm_to_vmem [thread:$0]  %s60_s22, 1024, %s62_s26, [#allocation6], %s811_s16, %s811_s16, %s812_s17  }
   0xc   :  { %s76_s27 = sshll.u32 %s815_s1, 4  ;;  %s77_s27 = int_to_ptr.vmem [resolvable:$true] %s76_s27 }
   0xd   :  { %82 = dma.hbm_to_vmem [thread:$0]  %s75_s24, 1024, %s77_s27, [#allocation9], %s811_s16, %s811_s16, %s812_s17  }
   0xe   :  { %802 = dma.done.wait [#allocation3], 128  }
   0xf   :  { %803 = vsyncadd [#allocation3], 4294967168 }
  0x10   :  { %804 = dma.done.wait [#allocation6], 1152  }
  0x11   :  { %805 = vsyncadd [#allocation6], 4294966144 }
  0x12   :  { %806 = dma.done.wait [#allocation9], 1024  }
  0x13   :  { %807 = vsyncadd [#allocation9], 4294966272  ;;  %v637_v0 = vld [vmem:[#allocation5] sm:$0xff]  ;;  %v645_v1 = vld [vmem:[%s977_s4 + $0x38] sm:$0xff]  ;;  %vm119_vm0 = vcmask 130048   ;;  %vm471_vm1 = vcmask 64512  }
  0x14   :  { %130 = vmatpush.bf16.msra.mxu0 %v637_v0  ;;  %v106_v2 = vld [vmem:[%s973_s0] sm:$0xf]  ;;  %206 = vmatpush.bf16.msra.mxu1 %v645_v1  ;;  %v644_v3 = vld [vmem:[%s977_s4 + $0x30] sm:$0xff]  ;;  %v643_v4 = vld [vmem:[%s977_s4 + $0x28] sm:$0xff]  ;;  %vm479_vm2 = vcmask 7168   ;;  %s488_s1 = sshll.u32 %s985_s12, 4  ;;  %s489_s1 = int_to_ptr.hbm [resolvable:$true] %s488_s1 }
  0x15   :  { %v642_v5 = vld [vmem:[%s977_s4 + $0x20] sm:$0xff]  ;;  %v641_v6 = vld [vmem:[%s977_s4 + $0x18] sm:$0xff]  ;;  %v640_v7 = vld [vmem:[%s977_s4 + $0x10] sm:$0xff] }
  0x16   :  { %v639_v8 = vld [vmem:[%s977_s4 + $0x8] sm:$0xff]  ;;  %v638_v9 = vld [vmem:[%s977_s4] sm:$0xff]  ;;  %v651_v12 = vld [vmem:[#allocation7 + $0x28] sm:$0xff] }
  0x17   :  { %508 = vmatmul.msk.bf16.vlgmr.msra.gmra.mxu0 %vm119_vm0, %v106_v2  ;;  %v653_v10 = vld [vmem:[#allocation7 + $0x38] sm:$0xff]  ;;  %v652_v11 = vld [vmem:[#allocation7 + $0x30] sm:$0xff]  ;;  %v650_v13 = vld [vmem:[#allocation7 + $0x20] sm:$0xff] }
  0x18   :  { %207 = vmatpush.bf16.msra.mxu1 %v644_v3  ;;  %289 = vmatpush.bf16.msra.mxu2 %v653_v10  ;;  %v649_v14 = vld [vmem:[#allocation7 + $0x18] sm:$0xff]  ;;  %v648_v15 = vld [vmem:[#allocation7 + $0x10] sm:$0xff]  ;;  %v647_v22 = vld [vmem:[#allocation7 + $0x8] sm:$0xff] }
  0x19   :  { %v677_v16 = vld [vmem:[%s976_s3] ss:$0 sm:$0xff]  ;;  %v646_v23 = vld [vmem:[#allocation7] sm:$0xff]  ;;  %v661_v24 = vld [vmem:[#allocation8 + $0x38] sm:$0xff] }
  0x1a   :  { %372 = vmatpush.bf16.msra.mxu3 %v661_v24  ;;  %v660_v25 = vld [vmem:[#allocation8 + $0x30] sm:$0xff]  ;;  %v659_v26 = vld [vmem:[#allocation8 + $0x28] sm:$0xff]  ;;  %v658_v27 = vld [vmem:[#allocation8 + $0x20] sm:$0xff] }
  0x1b   :  { %v657_v28 = vld [vmem:[#allocation8 + $0x18] sm:$0xff]  ;;  %v656_v29 = vld [vmem:[#allocation8 + $0x10] sm:$0xff]  ;;  %v655_v36 = vld [vmem:[#allocation8 + $0x8] sm:$0xff] }
  0x1c   :  { %208 = vmatpush.bf16.msra.mxu1 %v643_v4  ;;  %290 = vmatpush.bf16.msra.mxu2 %v652_v11  ;;  %v678_v30 = vld [vmem:[%s978_s5] ss:$0 sm:$0xff]  ;;  %v654_v37 = vld [vmem:[#allocation8] sm:$0xff]  ;;  %v669_v38 = vld [vmem:[%s983_s10 + $0x38] sm:$0xff] }
  0x1d   :  { %455 = vmatpush.bf16.msrb.mxu0 %v669_v38  ;;  %v668_v39 = vld [vmem:[%s983_s10 + $0x30] sm:$0xff]  ;;  %v667_v40 = vld [vmem:[%s983_s10 + $0x28] sm:$0xff]  ;;  %v666_v41 = vld [vmem:[%s983_s10 + $0x20] sm:$0xff] }
  0x1e   :  { %373 = vmatpush.bf16.msra.mxu3 %v660_v25  ;;  %v665_v42 = vld [vmem:[%s983_s10 + $0x18] sm:$0xff]  ;;  %v664_v43 = vld [vmem:[%s983_s10 + $0x10] sm:$0xff]  ;;  %v679_v44 = vld [vmem:[%s980_s7] ss:$0 sm:$0xff] }
  0x1f   :  { %v663_v50 = vld [vmem:[%s983_s10 + $0x8] sm:$0xff]  ;;  %v662_v51 = vld [vmem:[%s983_s10] sm:$0xff] }
  0x20   :  { %209 = vmatpush.bf16.msra.mxu1 %v642_v5  ;;  %291 = vmatpush.bf16.msra.mxu2 %v651_v12  ;;  %v468_v52 = vld [vmem:[#allocation2] sm:$0xff] }
  0x21   :  { %456 = vmatpush.bf16.msrb.mxu0 %v668_v39  ;;  %v473_v53 = vmul.f32 %v468_v52, %v468_v52  ;;  %v680_v55 = vld [vmem:[%s982_s9] ss:$0 sm:$0xff]  ;;  %v469_v1 = vmul.f32 0.70710677, %v468_v52  ;;  %s816_s9 = smov [#allocation10]  }
  0x22   :  { %374 = vmatpush.bf16.msra.mxu3 %v659_v26  ;;  %v681_v0 = vld [vmem:[%s984_s11] ss:$0 sm:$0xff]  ;;  %s486_s26 = sshll.u32 %s816_s9, 4  ;;  %s487_s26 = int_to_ptr.vmem [resolvable:$true] %s486_s26 }
  0x23   :  { %v474_v54 = vsel %vm471_vm1, %v473_v53, 0.0 }
  0x24   :  { %210 = vmatpush.bf16.msra.mxu1 %v641_v6  ;;  %292 = vmatpush.bf16.msra.mxu2 %v650_v13 }
  0x25   :  { %457 = vmatpush.bf16.msrb.mxu0 %v667_v40  ;;  %475 = vadd.xlane.f32.xlu0 %v474_v54 }
  0x26   :  { %375 = vmatpush.bf16.msra.mxu3 %v658_v27 }
  0x28   :  { %211 = vmatpush.bf16.msra.mxu1 %v640_v7  ;;  %293 = vmatpush.bf16.msra.mxu2 %v649_v14 }
  0x29   :  { %458 = vmatpush.bf16.msrb.mxu0 %v666_v41 }
  0x2a   :  { %376 = vmatpush.bf16.msra.mxu3 %v657_v28 }
  0x2c   :  { %212 = vmatpush.bf16.msra.mxu1 %v639_v8  ;;  %294 = vmatpush.bf16.msra.mxu2 %v648_v15 }
  0x2d   :  { %459 = vmatpush.bf16.msrb.mxu0 %v665_v42 }
  0x2e   :  { %377 = vmatpush.bf16.msra.mxu3 %v656_v29 }
  0x30   :  { %213 = vmatpush.bf16.msra.mxu1 %v638_v9  ;;  %295 = vmatpush.bf16.msra.mxu2 %v647_v22 }
  0x31   :  { %460 = vmatpush.bf16.msrb.mxu0 %v664_v43 }
  0x32   :  { %378 = vmatpush.bf16.msra.mxu3 %v655_v36 }
  0x34   :  { %296 = vmatpush.bf16.msra.mxu2 %v646_v23 }
  0x35   :  { %461 = vmatpush.bf16.msrb.mxu0 %v663_v50 }
  0x36   :  { %379 = vmatpush.bf16.msra.mxu3 %v654_v37 }
  0x39   :  { %462 = vmatpush.bf16.msrb.mxu0 %v662_v51 }
  0x94   :  { %v132_v17 = vpop.f32.mrf.mxu0 }
  0x95   :  { %v133_v18 = vadd.f32 %v677_v16, %v132_v17 }
  0x97   :  { %v136_v19 = vmax.f32 %v133_v18, 0.0 }
  0x98   :  { %v476_v61 = vpop.xlane.xlu0 %475 }
  0x99   :  { %v137_v20 = vpack.c.bf16 %v136_v19, %v136_v19  ;;  %v477_v62 = vmul.f32 -0.5, %v476_v61 }
  0x9b   :  { %214 = vmatmul.bf16.vlgmr.msra.gmra.mxu1 %v137_v20  ;;  %v478_v63 = vadd.f32 -4.5789194, %v477_v62 }
  0x9c   :  { %v134_v21 = vpop.f32.mrf.mxu0 }
  0x9d   :  { %480 = vst.msk [vmem:[%s986_s13] sm:$0xff] %vm479_vm2, %v478_v63 }
 0x118   :  { %v215_v31 = vpop.f32.mrf.mxu1 }
 0x119   :  { %v216_v32 = vadd.f32 %v678_v30, %v215_v31 }
 0x11b   :  { %v219_v33 = vmax.f32 %v216_v32, 0.0 }
 0x11d   :  { %v220_v34 = vpack.c.bf16 %v219_v33, %v219_v33 }
 0x11f   :  { %297 = vmatmul.bf16.vlgmr.msra.gmra.mxu2 %v220_v34 }
 0x120   :  { %v217_v35 = vpop.f32.mrf.mxu1 }
 0x1a2   :  { %v298_v45 = vpop.f32.mrf.mxu2 }
 0x1a3   :  { %v299_v46 = vadd.f32 %v679_v44, %v298_v45 }
 0x1a5   :  { %v302_v47 = vmax.f32 %v299_v46, 0.0 }
 0x1a7   :  { %v303_v48 = vpack.c.bf16 %v302_v47, %v302_v47 }
 0x1a9   :  { %380 = vmatmul.bf16.vlgmr.msra.gmra.mxu3 %v303_v48 }
 0x1aa   :  { %v300_v49 = vpop.f32.mrf.mxu2 }
 0x22c   :  { %v381_v56 = vpop.f32.mrf.mxu3 }
 0x22d   :  { %v382_v57 = vadd.f32 %v680_v55, %v381_v56 }
 0x22f   :  { %v385_v58 = vmax.f32 %v382_v57, 0.0 }
 0x231   :  { %v386_v59 = vpack.c.bf16 %v385_v58, %v385_v58 }
 0x233   :  { %463 = vmatmul.bf16.vlgmr.msrb.gmra.mxu0 %v386_v59 }
 0x234   :  { %v383_v60 = vpop.f32.mrf.mxu3 }
 0x2b0   :  { %v464_v2 = vpop.f32.mrf.mxu0 }
 0x2b1   :  { %v465_v3 = vadd.f32 %v681_v0, %v464_v2 }
 0x2b3   :  { %v470_v4 = vadd.f32 %v469_v1, %v465_v3 }
 0x2b5   :  { %472 = vst.msk [vmem:[#allocation10] sm:$0xff] %vm471_vm1, %v470_v4 }
 0x2b6   :  { %491 = dma.vmem_to_hbm [thread:$0]  %s487_s26, 128, %s489_s1, [#allocation4]  }
 0x2b8   :  { %v466_v5 = vpop.f32.mrf.mxu0 }
 0x2b9   :  { %808 = dma.done.wait [#allocation4], 128  }
 0x2ba   :  { %809 = vsyncadd [#allocation4], 4294967168 }
 0x2bb   :  { %500 = vsyncpa [#allocation3], 1 }
 0x2bc   :  { %501 = vsyncpa [#allocation6], 1 }
 0x2bd   :  { %502 = vsyncpa [#allocation9], 1 }
 0x2be   :  { %503 = vsyncpa [#allocation4], 1 }

</bundles_post_ra>
